<compile_context>
chip_gen: v7x
topology: tpu7x:2x2x1
jax: 0.10.0
libtpu: 0.0.40
codegen_flags: <defaults>
</compile_context>

<pallas_src>
import math
from functools import partial

import jax
import jax.numpy as jnp
from jax.experimental import pallas as pl
from jax.experimental.pallas import tpu as pltpu

LANE = 128     # lane width / padded output width
H_PAD = 128    # padded hidden width (actual fused hidden = 20 + 20 = 40)


def _round_up(x, m):
    return (x + m - 1) // m * m


# ---------------------------------------------------------------------------
# Kernel
# ---------------------------------------------------------------------------
def _fused_mlp_kernel(x_ref, w_ref, o_ref, *, feat, r_b1, r_w2, r_b2):
    """x: (TB, F) f32, w: packed slab (R, 128) f32, o: (TB, 128) f32."""
    x = x_ref[...]

    # Static-slice unpack of the single packed weight slab (no extra DMAs).
    w1 = w_ref[0:feat, :]                 # (F, 128)   [w1p | w1v | 0...]
    b1 = w_ref[r_b1:r_b1 + 1, :]          # (1, 128)   [b1p | b1v | 0...]
    w2 = w_ref[r_w2:r_w2 + H_PAD, :]      # (128, 128) block-diag(w2p, w2v), zero-padded
    b2 = w_ref[r_b2:r_b2 + 1, :]          # (1, 128)   [b2p | b2v | 0...]

    # One fused first-layer matmul for both heads (f32 accumulate on MXU).
    h = jnp.maximum(jnp.dot(x, w1, preferred_element_type=jnp.float32) + b1, 0.0)
    # One fused second-layer matmul; zero-padded rows/cols contribute nothing.
    o = jnp.maximum(jnp.dot(h, w2, preferred_element_type=jnp.float32) + b2, 0.0)

    o_ref[...] = o.astype(o_ref.dtype)    # single lane-dense store


# ---------------------------------------------------------------------------
# Host-side param packing: 8 arrays -> one (R, 128) slab
# ---------------------------------------------------------------------------
def pack_params(params, feature_dim, dim_pi=20, dim_vf=10):
    (w1p, b1p, w2p, b2p, w1v, b1v, w2v, b2v) = params
    F = feature_dim
    hid = 20                               # per-branch hidden width

    r_b1 = F                               # bias row for layer 1
    r_w2 = _round_up(F + 1, 8)             # 8-aligned start of W2 block
    r_b2 = r_w2 + H_PAD                    # bias row for layer 2
    R = _round_up(r_b2 + 1, 8)

    slab = jnp.zeros((R, LANE), jnp.float32)
    # Layer 1: hidden cols 0..19 -> policy, 20..39 -> value.
    slab = slab.at[0:F, 0:hid].set(w1p)
    slab = slab.at[0:F, hid:2 * hid].set(w1v)
    slab = slab.at[r_b1, 0:hid].set(b1p[0])
    slab = slab.at[r_b1, hid:2 * hid].set(b1v[0])
    # Layer 2: block-diagonal; output cols 0..19 -> pi, 20..29 -> vf.
    slab = slab.at[r_w2:r_w2 + hid, 0:dim_pi].set(w2p)
    slab = slab.at[r_w2 + hid:r_w2 + 2 * hid, dim_pi:dim_pi + dim_vf].set(w2v)
    slab = slab.at[r_b2, 0:dim_pi].set(b2p[0])
    slab = slab.at[r_b2, dim_pi:dim_pi + dim_vf].set(b2v[0])

    meta = dict(feat=F, r_b1=r_b1, r_w2=r_w2, r_b2=r_b2,
                dim_pi=dim_pi, dim_vf=dim_vf)
    return slab, meta


# ---------------------------------------------------------------------------
# Wrapper
# ---------------------------------------------------------------------------
def custom_network_forward(features, slab, meta, *, block_b=512):
    """features: (B, F) f32. Returns (pi, vf) = ((B, 20), (B, 10))."""
    B, F = features.shape
    assert F == meta["feat"]

    TB = min(block_b, _round_up(B, 8))     # batch tile (multiple of 8)
    B_pad = _round_up(B, TB)
    if B_pad != B:
        features = jnp.pad(features, ((0, B_pad - B), (0, 0)))
    R = slab.shape[0]
    grid = (B_pad // TB,)

    kernel = partial(_fused_mlp_kernel, feat=F,
                     r_b1=meta["r_b1"], r_w2=meta["r_w2"], r_b2=meta["r_b2"])

    out = pl.pallas_call(
        kernel,
        out_shape=jax.ShapeDtypeStruct((B_pad, LANE), jnp.float32),
        grid=grid,
        in_specs=[
            pl.BlockSpec((TB, F), lambda i: (i, 0)),        # batch-tiled features
            pl.BlockSpec((R, LANE), lambda i: (0, 0)),      # weights VMEM-resident
        ],
        out_specs=pl.BlockSpec((TB, LANE), lambda i: (i, 0)),
        compiler_params=pltpu.CompilerParams(
            dimension_semantics=("parallel",)),             # v7x: shard batch over 2 TCs
    )(features, slab)

    pi = out[:B, 0:meta["dim_pi"]]
    vf = out[:B, meta["dim_pi"]:meta["dim_pi"] + meta["dim_vf"]]
    return pi, vf


# ---------------------------------------------------------------------------
# Init + reference (PyTorch nn.Linear default init, weights stored (in, out))
# ---------------------------------------------------------------------------
def init_params(key, feature_dim, last_layer_dim_pi=20, last_layer_dim_vf=10):
    keys = jax.random.split(key, 8)

    def linear(kw, kb, fan_in, fan_out):
        bound = 1.0 / math.sqrt(fan_in)
        w = jax.random.uniform(kw, (fan_in, fan_out), jnp.float32, -bound, bound)
        b = jax.random.uniform(kb, (1, fan_out), jnp.float32, -bound, bound)
        return w, b

    w1p, b1p = linear(keys[0], keys[1], feature_dim, 20)
    w2p, b2p = linear(keys[2], keys[3], 20, last_layer_dim_pi)
    w1v, b1v = linear(keys[4], keys[5], feature_dim, 20)
    w2v, b2v = linear(keys[6], keys[7], 20, last_layer_dim_vf)
    return (w1p, b1p, w2p, b2p, w1v, b1v, w2v, b2v)


def _reference_forward(features, params):
    (w1p, b1p, w2p, b2p, w1v, b1v, w2v, b2v) = params
    relu = lambda v: jnp.maximum(v, 0.0)
    pi = relu(relu(features @ w1p + b1p) @ w2p + b2p)
    vf = relu(relu(features @ w1v + b1v) @ w2v + b2v)
    return pi, vf


if __name__ == "__main__":
    key = jax.random.PRNGKey(0)
    k_x, k_p, k_x2 = jax.random.split(key, 3)

    batch = 8
    feature_dim = 32

    features = jax.random.normal(k_x, (batch, feature_dim), dtype=jnp.float32)
    params = init_params(k_p, feature_dim)
    slab, meta = pack_params(params, feature_dim)

    # Small-batch path (grid=(1,))
    pi, vf = custom_network_forward(features, slab, meta)
    jax.block_until_ready((pi, vf))
    pi_ref, vf_ref = _reference_forward(features, params)
    assert pi.shape == (batch, 20) and vf.shape == (batch, 10)
    assert jnp.allclose(pi, pi_ref, atol=1e-5, rtol=1e-5)
    assert jnp.allclose(vf, vf_ref, atol=1e-5, rtol=1e-5)

    # Multi-step batch grid + padding path (B=37, TB=16 -> grid=(3,), resident weights)
    B2 = 37
    features2 = jax.random.normal(k_x2, (B2, feature_dim), dtype=jnp.float32)
    pi2, vf2 = custom_network_forward(features2, slab, meta, block_b=16)
    jax.block_until_ready((pi2, vf2))
    pi2_ref, vf2_ref = _reference_forward(features2, params)
    assert pi2.shape == (B2, 20) and vf2.shape == (B2, 10)
    assert jnp.allclose(pi2, pi2_ref, atol=1e-5, rtol=1e-5)
    assert jnp.allclose(vf2, vf2_ref, atol=1e-5, rtol=1e-5)

    print("KERNEL_OK")
</pallas_src>

<mosaic_0001>
module attributes {stable_mosaic.version = 11 : i64} {
  func.func @_fused_mlp_kernel(%arg0: i32, %arg1: memref<8x32xf32, #tpu.memory_space<vmem>>, %arg2: memref<176x128xf32, #tpu.memory_space<vmem>>, %arg3: memref<8x128xf32, #tpu.memory_space<vmem>>) attributes {dimension_semantics = [#tpu.dimension_semantics<parallel>], iteration_bounds = array<i64: 1>, scalar_prefetch = 0 : i64, scratch_operands = 0 : i64, tpu.core_type = #tpu.core_type<tc>, window_params = [{transform_indices = @transform_0, window_bounds = array<i64: 8, 32>}, {pipeline_mode = #tpu.pipeline_mode<synchronous>, transform_indices = @transform_1, window_bounds = array<i64: 176, 128>}, {transform_indices = @transform_2, window_bounds = array<i64: 8, 128>}]} {
    %c0 = arith.constant 0 : index
    %c0_0 = arith.constant 0 : index
    %0 = vector.load %arg1[%c0, %c0_0] : memref<8x32xf32, #tpu.memory_space<vmem>>, vector<8x32xf32>
    %c0_1 = arith.constant 0 : index
    %c0_2 = arith.constant 0 : index
    %1 = vector.load %arg2[%c0_1, %c0_2] : memref<176x128xf32, #tpu.memory_space<vmem>>, vector<32x128xf32>
    %c32 = arith.constant 32 : index
    %c0_3 = arith.constant 0 : index
    %2 = vector.load %arg2[%c32, %c0_3] : memref<176x128xf32, #tpu.memory_space<vmem>>, vector<1x128xf32>
    %c40 = arith.constant 40 : index
    %c0_4 = arith.constant 0 : index
    %3 = vector.load %arg2[%c40, %c0_4] : memref<176x128xf32, #tpu.memory_space<vmem>>, vector<128x128xf32>
    %c168 = arith.constant 168 : index
    %c0_5 = arith.constant 0 : index
    %4 = vector.load %arg2[%c168, %c0_5] : memref<176x128xf32, #tpu.memory_space<vmem>>, vector<1x128xf32>
    %cst = arith.constant dense<0.000000e+00> : vector<8x128xf32>
    %5 = tpu.matmul %0, %1, %cst {dimension_numbers = #tpu.dot_dimension_numbers<[1], [0], [0], [1], [0, 0, 1, 1], [], []>} : vector<8x32xf32>, vector<32x128xf32>, vector<8x128xf32> -> vector<8x128xf32>
    %6 = vector.broadcast %2 : vector<1x128xf32> to vector<8x128xf32>
    %7 = arith.addf %5, %6 : vector<8x128xf32>
    %cst_6 = arith.constant 0.000000e+00 : f32
    %8 = vector.broadcast %cst_6 : f32 to vector<8x128xf32>
    %9 = arith.maximumf %7, %8 : vector<8x128xf32>
    %cst_7 = arith.constant dense<0.000000e+00> : vector<8x128xf32>
    %10 = tpu.matmul %9, %3, %cst_7 {dimension_numbers = #tpu.dot_dimension_numbers<[1], [0], [0], [1], [0, 0, 1, 1], [], []>} : vector<8x128xf32>, vector<128x128xf32>, vector<8x128xf32> -> vector<8x128xf32>
    %11 = vector.broadcast %4 : vector<1x128xf32> to vector<8x128xf32>
    %12 = arith.addf %10, %11 : vector<8x128xf32>
    %cst_8 = arith.constant 0.000000e+00 : f32
    %13 = vector.broadcast %cst_8 : f32 to vector<8x128xf32>
    %14 = arith.maximumf %12, %13 : vector<8x128xf32>
    %c0_9 = arith.constant 0 : index
    %c0_10 = arith.constant 0 : index
    %15 = vector.load %arg3[%c0_9, %c0_10] : memref<8x128xf32, #tpu.memory_space<vmem>>, vector<8x128xf32>
    tpu.vector_store %arg3[%c0_9, %c0_10], %14 {strides = array<i32>} : memref<8x128xf32, #tpu.memory_space<vmem>>, vector<8x128xf32>,
    return
  }
  func.func @transform_0(%arg0: i32) -> (i32, i32) {
    %c0_i32 = arith.constant 0 : i32
    %c0_i32_0 = arith.constant 0 : i32
    return %arg0, %c0_i32 : i32, i32
  }
  func.func @transform_1(%arg0: i32) -> (i32, i32) {
    %c0_i32 = arith.constant 0 : i32
    %c0_i32_0 = arith.constant 0 : i32
    %c0_i32_1 = arith.constant 0 : i32
    return %c0_i32, %c0_i32_0 : i32, i32
  }
  func.func @transform_2(%arg0: i32) -> (i32, i32) {
    %c0_i32 = arith.constant 0 : i32
    %c0_i32_0 = arith.constant 0 : i32
    return %arg0, %c0_i32 : i32, i32
  }
}

</mosaic_0001>

<bundles_post_ra>
// kernel: tpu_custom_call.1
= control target key start
LH: loop header
LB: loop body
LE: loop exit
PB: predicated region body
PF: predicated region fallthrough
CT: control target
= control target key end

     0   :  { %7 = vsyncpa [#allocation3], 0  ;;  %s479_s0 = inlined_call_operand.hbm [shape: f32[8,32], index: 0, kind: input, shape index: {}]   ;;  %s480_s1 = inlined_call_operand.hbm [shape: f32[176,128], index: 1, kind: input, shape index: {}]   ;;  %s481_s2 = inlined_call_operand.hbm [shape: f32[8,128], index: 2, kind: output, shape index: {}]  }
   0x1   :  { %8 = vsyncpa [#allocation6], 0 }
   0x2   :  { %9 = vsyncpa [#allocation4], 0  ;;  %s413_s9 = smov [#allocation2]   ;;  %s414_s11 = smov [#allocation5]  }
   0x3   :  { %s16_s10 = sshll.u32 %s413_s9, 4  ;;  %s25_s12 = sshll.u32 %s414_s11, 4  ;;  %s17_s10 = int_to_ptr.vmem [resolvable:$true] %s16_s10  ;;  %s436_s12 = int_to_ptr.vmem [resolvable:$true] %s25_s12 }
   0x4   :  { %s341_s15 = scalar_lea.hbm %s479_s0, 128 }
   0x5   :  { %p342_p0 = scmp.ne.s32.totalorder %s479_s0, %s341_s15  ;;  %p345_p1 = scmp.lt.u32.totalorder %s341_s15, %s479_s0 }
   0x7   :  { %p347_p2 = pnand %p345_p1, %p342_p0 }
   0x9   :  { %350 = shalt.err (!%p347_p2)
}
   0xa   :  { %s351_s20 = scalar_lea.vmem %s17_s10, 128  ;;  %p356_p4 = scmp.lt.s32.totalorder %s17_s10, %s17_s10 }
   0xb   :  { %p352_p3 = scmp.ne.s32.totalorder %s17_s10, %s351_s20  ;;  %p357_p5 = scmp.lt.s32.totalorder %s351_s20, %s351_s20 }
   0xd   :  { %p358_p6 = por %p357_p5, %p356_p4 }
   0xf   :  { %p359_p7 = pnand %p358_p6, %p352_p3 }
  0x11   :  { %362 = shalt.err (!%p359_p7)
}
  0x12   :  { %19 = dma.hbm_to_vmem [thread:$0]  %s479_s0, 128, %s17_s10, [#allocation3]  }
  0x13   :  { %s363_s25 = scalar_lea.hbm %s480_s1, 2816 }
  0x14   :  { %p364_p8 = scmp.ne.s32.totalorder %s480_s1, %s363_s25  ;;  %p367_p9 = scmp.lt.u32.totalorder %s363_s25, %s480_s1 }
  0x16   :  { %p369_p10 = pnand %p367_p9, %p364_p8 }
  0x18   :  { %372 = shalt.err (!%p369_p10)
}
  0x19   :  { %s373_s30 = scalar_lea.vmem %s436_s12, 2816  ;;  %p378_p12 = scmp.lt.s32.totalorder %s436_s12, %s436_s12 }
  0x1a   :  { %p374_p11 = scmp.ne.s32.totalorder %s436_s12, %s373_s30  ;;  %p379_p13 = scmp.lt.s32.totalorder %s373_s30, %s373_s30 }
  0x1c   :  { %p380_p0 = por %p379_p13, %p378_p12 }
  0x1e   :  { %p381_p1 = pnand %p380_p0, %p374_p11 }
  0x20   :  { %384 = shalt.err (!%p381_p1)
}
  0x21   :  { %s415_s0 = smov 128   ;;  %s416_s3 = smov 8  }
  0x22   :  { %31 = dma.hbm_to_vmem [thread:$0]  %s480_s1, 2816, %s436_s12, [#allocation6], %s415_s0, %s415_s0, %s416_s3  }
  0x23   :  { %407 = dma.done.wait [#allocation3], 128  }
  0x24   :  { %408 = vsyncadd [#allocation3], 4294967168 }
  0x25   :  { %409 = dma.done.wait [#allocation6], 2816  }
  0x26   :  { %410 = vsyncadd [#allocation6], 4294964480  ;;  %v417_v0 = vmov 0.0|0.0   ;;  %vm418_vm0 = vmmov 0   ;;  %v419_v1 = vmov 0.0   ;;  %v39_v2 = vld [vmem:[#allocation5] sm:$0xff] }
  0x27   :  { %303 = vmatprep.subr.bf16.mxu0 %v417_v0  ;;  %265 = vmatprep.mubr.msk.f32.mxu0 %vm418_vm0, %v419_v1  ;;  %v40_v3 = vld [vmem:[#allocation5 + $0x8] sm:$0xff]  ;;  %v41_v4 = vld [vmem:[#allocation5 + $0x10] sm:$0xff]  ;;  %v42_v6 = vld [vmem:[#allocation5 + $0x18] sm:$0xff]  ;;  %vm65_vm1 = vcmask 261120   ;;  %s420_s1 = smov [#allocation7]  }
  0x28   :  { %309 = vmatprep.subr.bf16.mxu1 %v417_v0  ;;  %300 = vmatprep.mubr.msk.f32.mxu1 %vm418_vm0, %v419_v1  ;;  %v304_v5 = vpack.c.bf16 %v40_v3, %v39_v2  ;;  %v44_v7 = vld [vmem:[#allocation5 + $0x28] sm:$0xff]  ;;  %v45_v8 = vld [vmem:[#allocation5 + $0x30] sm:$0xff]  ;;  %v46_v9 = vld [vmem:[#allocation5 + $0x38] sm:$0xff]  ;;  %v307_v11 = vpack.c.bf16 %v42_v6, %v41_v4  ;;  %s222_s6 = sshll.u32 %s420_s1, 4  ;;  %s223_s6 = int_to_ptr.vmem [resolvable:$true] %s222_s6 }
  0x29   :  { %v47_v10 = vld [vmem:[#allocation5 + $0x40] sm:$0xff]  ;;  %v310_v12 = vpack.c.bf16 %v45_v8, %v44_v7  ;;  %v48_v14 = vld [vmem:[#allocation5 + $0x48] sm:$0xff]  ;;  %v49_v15 = vld [vmem:[#allocation5 + $0x50] sm:$0xff]  ;;  %s385_s7 = scalar_lea.vmem %s223_s6, 128  ;;  %p390_p3 = scmp.lt.s32.totalorder %s223_s6, %s223_s6 }
  0x2a   :  { %305 = vmatpush3.bf16.msra.mxu0 %v304_v5  ;;  %v313_v13 = vpack.c.bf16 %v47_v10, %v46_v9  ;;  %v38_v16 = vld [vmem:[#allocation2] sm:$0xff]  ;;  %v316_v17 = vpack.c.bf16 %v49_v15, %v48_v14  ;;  %v51_v19 = vld [vmem:[#allocation5 + $0x60] sm:$0xff]  ;;  %v52_v21 = vld [vmem:[#allocation5 + $0x68] sm:$0xff]  ;;  %p386_p2 = scmp.ne.s32.totalorder %s223_s6, %s385_s7  ;;  %p391_p4 = scmp.lt.s32.totalorder %s385_s7, %s385_s7 }
  0x2b   :  { %306 = vmatprep.subr.bf16.mxu0 %v417_v0  ;;  %311 = vmatpush3.bf16.msra.mxu1 %v310_v12  ;;  %v50_v18 = vld [vmem:[#allocation5 + $0x58] sm:$0xff]  ;;  %v53_v22 = vld [vmem:[#allocation5 + $0x70] sm:$0xff]  ;;  %v55_v25 = vld [vmem:[#allocation5 + $0x80] sm:$0xff] }
  0x2c   :  { %312 = vmatprep.subr.bf16.mxu1 %v417_v0  ;;  %v319_v20 = vpack.c.bf16 %v51_v19, %v50_v18  ;;  %v322_v23 = vpack.c.bf16 %v53_v22, %v52_v21  ;;  %v54_v24 = vld [vmem:[#allocation5 + $0x78] sm:$0xff]  ;;  %v56_v27 = vld [vmem:[#allocation5 + $0x88] sm:$0xff]  ;;  %v57_v28 = vld [vmem:[#allocation5 + $0x90] sm:$0xff]  ;;  %p392_p5 = por %p391_p4, %p390_p3 }
  0x2d   :  { %v325_v26 = vpack.c.bf16 %v55_v25, %v54_v24  ;;  %v328_v29 = vpack.c.bf16 %v57_v28, %v56_v27  ;;  %v58_v30 = vld [vmem:[#allocation5 + $0x98] sm:$0xff]  ;;  %v59_v31 = vld [vmem:[#allocation5 + $0xa0] sm:$0xff]  ;;  %v234_v38 = vld [vmem:[#allocation5 + $0xa8] ss:$0 sm:$0xff] }
  0x2e   :  { %308 = vmatpush3.bf16.msra.mxu0 %v307_v11  ;;  %v331_v32 = vpack.c.bf16 %v59_v31, %v58_v30  ;;  %v232_v33 = vld [vmem:[#allocation5 + $0x20] ss:$0 sm:$0xff]  ;;  %p393_p6 = pnand %p392_p5, %p386_p2 }
  0x2f   :  { %314 = vmatpush3.bf16.msra.mxu1 %v313_v13 }
  0x30   :  { %315 = vmatprep.subr.bf16.mxu1 %v417_v0 }
  0x31   :  { %266 = vmatmul.mubr.msk.f32.vlgmr.msra.gmra.mrb[0].mxu0 %vm65_vm1, %v38_v16 }
  0x33   :  { %317 = vmatpush3.bf16.msra.mxu1 %v316_v17 }
  0x34   :  { %318 = vmatprep.subr.bf16.mxu1 %v417_v0 }
  0x37   :  { %320 = vmatpush3.bf16.msra.mxu1 %v319_v20 }
  0x38   :  { %321 = vmatprep.subr.bf16.mxu1 %v417_v0 }
  0x3b   :  { %323 = vmatpush3.bf16.msra.mxu1 %v322_v23 }
  0x3c   :  { %324 = vmatprep.subr.bf16.mxu1 %v417_v0 }
  0x3f   :  { %326 = vmatpush3.bf16.msra.mxu1 %v325_v26 }
  0x40   :  { %327 = vmatprep.subr.bf16.mxu1 %v417_v0 }
  0x43   :  { %329 = vmatpush3.bf16.msra.mxu1 %v328_v29 }
  0x44   :  { %330 = vmatprep.subr.bf16.mxu1 %v417_v0 }
  0x47   :  { %332 = vmatpush3.bf16.msra.mxu1 %v331_v32 }
 0x104   :  { %v135_v34 = vpop.f32.mrb[0].mxu0 }
 0x105   :  { %v136_v35 = vadd.f32 %v232_v33, %v135_v34  ;;  %v267_v36 = vpop.f32.mrb[1].mxu0 }
 0x107   :  { %v139_v37 = vmax.f32 %v136_v35, 0.0 }
 0x109   :  { %301 = vmatmul.mubr.f32.vlgmr.msra.gmra.mrb[0].mxu1 %v139_v37 }
 0x1dc   :  { %v210_v39 = vpop.f32.mrb[0].mxu1 }
 0x1dd   :  { %v211_v40 = vadd.f32 %v234_v38, %v210_v39  ;;  %v302_v41 = vpop.f32.mrb[1].mxu1 }
 0x1df   :  { %v214_v42 = vmax.f32 %v211_v40, 0.0 }
 0x1e1   :  { %215 = vst [vmem:[#allocation7] sm:$0xff] %v214_v42 }
 0x1e2   :  { %396 = shalt.err (!%p393_p6)
}
 0x1e3   :  { %s397_s10 = scalar_lea.hbm %s481_s2, 128 }
 0x1e4   :  { %p398_p7 = scmp.ne.s32.totalorder %s481_s2, %s397_s10  ;;  %p401_p8 = scmp.lt.u32.totalorder %s397_s10, %s481_s2 }
 0x1e6   :  { %p403_p9 = pnand %p401_p8, %p398_p7 }
 0x1e8   :  { %406 = shalt.err (!%p403_p9)
}
 0x1e9   :  { %225 = dma.vmem_to_hbm [thread:$0]  %s223_s6, 128, %s481_s2, [#allocation4]  }
 0x1ea   :  { %411 = dma.done.wait [#allocation4], 128  }
 0x1eb   :  { %412 = vsyncadd [#allocation4], 4294967168 }
 0x1ec   :  { %229 = vsyncpa [#allocation3], 1 }
 0x1ed   :  { %230 = vsyncpa [#allocation6], 1 }
 0x1ee   :  { %231 = vsyncpa [#allocation4], 1 }

</bundles_post_ra>
